<compile_context>
chip_gen: v7x
topology: tpu7x:2x2x1
jax: 0.10.0
libtpu: 0.0.40
codegen_flags: <defaults>
</compile_context>

<pallas_src>
import jax
import jax.numpy as jnp
import numpy as np
from jax.experimental import pallas as pl
from jax.experimental.pallas import tpu as pltpu


def _classifier_kernel(x_ref, w1t_ref, b1_ref, w2_ref, b2_ref, o_ref):
    """One grid step == one tile of TB batch elements.

    x_ref  : (TB, C, HW)   NCHW images with spatial flattened (HW on lanes)
    w1t_ref: (F, C)        pointwise encoder weight, pre-transposed (MXU dtype)
    b1_ref : (F, 1)        encoder bias, f32
    w2_ref : (F, NCP)      classifier weight * (1/HW), zero-padded to NCP (MXU dtype)
    b2_ref : (1, NCP)      classifier bias, zero-padded, f32
    o_ref  : (1, TB, NCP)  padded logits for this batch tile (lane-dense store)
    """
    TB, C, HW = x_ref.shape
    F = w1t_ref.shape[0]
    mxu_dtype = w1t_ref.dtype

    # Fold the batch tile into the lane axis: (TB, C, HW) -> (C, TB*HW).
    if TB == 1:
        x2 = x_ref[0]                                             # free squeeze
    else:
        x2 = jnp.transpose(x_ref[...], (1, 0, 2)).reshape(C, TB * HW)

    # Encoder 1x1 conv as a single 2-D MXU matmul (weight pushed once).
    h = jnp.dot(w1t_ref[...], x2.astype(mxu_dtype),
                preferred_element_type=jnp.float32)               # (F, TB*HW) f32
    h = jnp.maximum(h + b1_ref[...], 0.0)                         # bias + ReLU (f32 VPU)

    # Global average pool: per-batch-segment lane reduction (1/HW lives in w2).
    if TB == 1:
        pooled = jnp.sum(h, axis=-1, keepdims=True)               # (F, 1)
    else:
        pooled = jnp.sum(h.reshape(F, TB, HW), axis=-1)           # (F, TB)
    feat = pooled.T                                               # (TB, F) tiny transpose

    # Classifier: (TB, F) @ (F, NCP), lane-dense padded output.
    pred = jnp.dot(feat.astype(mxu_dtype), w2_ref[...],
                   preferred_element_type=jnp.float32) + b2_ref[...]
    o_ref[0] = pred.astype(o_ref.dtype)


def pretrained_image_classifier(x_nchw, w1, b1, w2, b2, *,
                                batch_tile=128, mxu_dtype=jnp.bfloat16):
    """x_nchw: (B, C, H, W). Returns logits (B, num_cls) in float32."""
    B, C, H, W = x_nchw.shape
    F = w1.shape[1]
    num_cls = w2.shape[1]
    HW = H * W

    # Lane-dense padded class dimension (multiple of 128).
    NCP = max(128, pl.cdiv(num_cls, 128) * 128)

    # Batch tiling: big tiles amortize per-step overhead, but keep >= 2 grid
    # steps whenever B >= 2 so the "parallel" axis can shard over v7x's 2 TCs.
    TB = max(1, min(batch_tile, pl.cdiv(B, 2)))
    G = pl.cdiv(B, TB)
    Bp = G * TB

    # Pure reshape of x (free view); pad the batch if needed.
    x = x_nchw.reshape(B, C, HW)
    if Bp != B:
        x = jnp.pad(x, ((0, Bp - B), (0, 0), (0, 0)))

    # Tiny host-side parameter prep (negligible vs. x traffic).
    w1t = w1.T.astype(mxu_dtype)                                  # (F, C)
    b1c = b1.reshape(F, 1).astype(jnp.float32)                    # (F, 1)
    w2p = jnp.zeros((F, NCP), jnp.float32).at[:, :num_cls].set(
        w2.astype(jnp.float32) * (1.0 / HW)).astype(mxu_dtype)    # pool 1/HW folded in
    b2p = jnp.zeros((1, NCP), jnp.float32).at[:, :num_cls].set(
        b2.reshape(1, num_cls).astype(jnp.float32))

    # Explicit VMEM budget: double-buffered x/out/param blocks + live intermediates.
    isz = lambda dt: np.dtype(dt).itemsize
    x_blk = TB * C * HW * isz(x.dtype)
    o_blk = TB * NCP * 4
    p_blk = F * C * isz(mxu_dtype) + F * 4 + F * NCP * isz(mxu_dtype) + NCP * 4
    live = F * TB * HW * 4 + TB * C * HW * isz(mxu_dtype)
    vmem_limit = int(min(64 << 20,
                         max(32 << 20,
                             2 * (x_blk + o_blk + p_blk) + 2 * live + (1 << 20))))

    out = pl.pallas_call(
        _classifier_kernel,
        out_shape=jax.ShapeDtypeStruct((G, TB, NCP), jnp.float32),
        grid_spec=pltpu.PrefetchScalarGridSpec(
            num_scalar_prefetch=0,
            grid=(G,),
            in_specs=[
                pl.BlockSpec((TB, C, HW), lambda i: (i, 0, 0)),
                pl.BlockSpec((F, C), lambda i: (0, 0)),
                pl.BlockSpec((F, 1), lambda i: (0, 0)),
                pl.BlockSpec((F, NCP), lambda i: (0, 0)),
                pl.BlockSpec((1, NCP), lambda i: (0, 0)),
            ],
            out_specs=pl.BlockSpec((1, TB, NCP), lambda i: (i, 0, 0)),
        ),
        compiler_params=pltpu.CompilerParams(
            dimension_semantics=("parallel",),
            vmem_limit_bytes=vmem_limit,
        ),
    )(x, w1t, b1c, w2p, b2p)

    # Strip batch/class padding.
    return out.reshape(Bp, NCP)[:B, :num_cls]


def _reference(x_nchw, w1, b1, w2, b2):
    """Pure-JAX f32 reference of the same forward pass."""
    B, C, H, W = x_nchw.shape
    x = x_nchw.reshape(B, C, H * W).astype(jnp.float32)
    h = jnp.maximum(jnp.einsum("cf,bcp->bfp", w1, x) + b1[None, :, None], 0.0)
    feat = jnp.mean(h, axis=-1)                  # (B, F) == img_encoder(x)
    return feat @ w2 + b2                        # (B, num_cls) == classifier(feat)


if __name__ == "__main__":
    # Small shapes consistent with the module's forward:
    B, C, H, W = 2, 4, 16, 16        # image batch, NCHW
    feature_dim = 32                 # encoder output dim
    num_cls = 8                      # classifier classes

    key = jax.random.PRNGKey(0)
    k_x, k_w1, k_b1, k_w2, k_b2 = jax.random.split(key, 5)

    x = jax.random.normal(k_x, (B, C, H, W), dtype=jnp.float32)
    # Synthetic deterministic parameters (shapes from the module's __init__):
    w1 = 0.1 * jax.random.normal(k_w1, (C, feature_dim), dtype=jnp.float32)
    b1 = 0.01 * jax.random.normal(k_b1, (feature_dim,), dtype=jnp.float32)
    # nn.Linear(feature_dim, num_cls): weight (num_cls, feature_dim) -> stored transposed.
    w2 = 0.1 * jax.random.normal(k_w2, (feature_dim, num_cls), dtype=jnp.float32)
    b2 = 0.01 * jax.random.normal(k_b2, (num_cls,), dtype=jnp.float32)

    pred = pretrained_image_classifier(x, w1, b1, w2, b2)
    pred = jax.block_until_ready(pred)

    ref = _reference(x, w1, b1, w2, b2)
    assert pred.shape == (B, num_cls)
    # bf16 MXU operands with f32 accumulation -> relaxed tolerance vs f32 ref.
    assert jnp.allclose(pred, ref, atol=2e-2, rtol=2e-2), "mismatch vs reference"

    print("KERNEL_OK")
</pallas_src>

<mosaic_0001>
module attributes {stable_mosaic.version = 11 : i64} {
  func.func @_classifier_kernel(%arg0: i32, %arg1: memref<1x4x256xf32, #tpu.memory_space<vmem>>, %arg2: memref<32x4xbf16, #tpu.memory_space<vmem>>, %arg3: memref<32x1xf32, #tpu.memory_space<vmem>>, %arg4: memref<32x128xbf16, #tpu.memory_space<vmem>>, %arg5: memref<1x128xf32, #tpu.memory_space<vmem>>, %arg6: memref<1x1x128xf32, #tpu.memory_space<vmem>>) attributes {dimension_semantics = [#tpu.dimension_semantics<parallel>], iteration_bounds = array<i64: 2>, scalar_prefetch = 0 : i64, scratch_operands = 0 : i64, tpu.core_type = #tpu.core_type<tc>, window_params = [{transform_indices = @transform_0, window_bounds = array<i64: 1, 4, 256>}, {pipeline_mode = #tpu.pipeline_mode<synchronous>, transform_indices = @transform_1, window_bounds = array<i64: 32, 4>}, {pipeline_mode = #tpu.pipeline_mode<synchronous>, transform_indices = @transform_2, window_bounds = array<i64: 32, 1>}, {pipeline_mode = #tpu.pipeline_mode<synchronous>, transform_indices = @transform_3, window_bounds = array<i64: 32, 128>}, {pipeline_mode = #tpu.pipeline_mode<synchronous>, transform_indices = @transform_4, window_bounds = array<i64: 1, 128>}, {transform_indices = @transform_5, window_bounds = array<i64: 1, 1, 128>}]} {
    %c0 = arith.constant 0 : index
    %c0_0 = arith.constant 0 : index
    %c0_1 = arith.constant 0 : index
    %0 = vector.load %arg1[%c0, %c0_0, %c0_1] : memref<1x4x256xf32, #tpu.memory_space<vmem>>, vector<1x4x256xf32>
    %1 = vector.shape_cast %0 : vector<1x4x256xf32> to vector<4x256xf32>
    %c0_2 = arith.constant 0 : index
    %c0_3 = arith.constant 0 : index
    %2 = vector.load %arg2[%c0_2, %c0_3] : memref<32x4xbf16, #tpu.memory_space<vmem>>, vector<32x4xbf16>
    %3 = arith.truncf %1 : vector<4x256xf32> to vector<4x256xbf16>
    %cst = arith.constant dense<0.000000e+00> : vector<32x256xf32>
    %4 = tpu.matmul %2, %3, %cst {dimension_numbers = #tpu.dot_dimension_numbers<[1], [0], [0], [1], [0, 0, 1, 1], [], []>} : vector<32x4xbf16>, vector<4x256xbf16>, vector<32x256xf32> -> vector<32x256xf32>
    %c0_4 = arith.constant 0 : index
    %c0_5 = arith.constant 0 : index
    %5 = vector.load %arg3[%c0_4, %c0_5] : memref<32x1xf32, #tpu.memory_space<vmem>>, vector<32x1xf32>
    %6 = vector.broadcast %5 : vector<32x1xf32> to vector<32x256xf32>
    %7 = arith.addf %4, %6 : vector<32x256xf32>
    %cst_6 = arith.constant 0.000000e+00 : f32
    %8 = vector.broadcast %cst_6 : f32 to vector<32x256xf32>
    %9 = arith.maximumf %7, %8 : vector<32x256xf32>
    %cst_7 = arith.constant dense<0.000000e+00> : vector<32xf32>
    %10 = vector.multi_reduction <add>, %9, %cst_7 [1] : vector<32x256xf32> to vector<32xf32>
    %11 = vector.shape_cast %10 : vector<32xf32> to vector<32x1xf32>
    %12 = tpu.transpose %11, [1, 0] : vector<32x1xf32> -> vector<1x32xf32>
    %13 = arith.truncf %12 : vector<1x32xf32> to vector<1x32xbf16>
    %c0_8 = arith.constant 0 : index
    %c0_9 = arith.constant 0 : index
    %14 = vector.load %arg4[%c0_8, %c0_9] : memref<32x128xbf16, #tpu.memory_space<vmem>>, vector<32x128xbf16>
    %cst_10 = arith.constant dense<0.000000e+00> : vector<1x128xf32>
    %15 = tpu.matmul %13, %14, %cst_10 {dimension_numbers = #tpu.dot_dimension_numbers<[1], [0], [0], [1], [0, 0, 1, 1], [], []>} : vector<1x32xbf16>, vector<32x128xbf16>, vector<1x128xf32> -> vector<1x128xf32>
    %c0_11 = arith.constant 0 : index
    %c0_12 = arith.constant 0 : index
    %16 = vector.load %arg5[%c0_11, %c0_12] : memref<1x128xf32, #tpu.memory_space<vmem>>, vector<1x128xf32>
    %17 = arith.addf %15, %16 : vector<1x128xf32>
    %c0_13 = arith.constant 0 : index
    %c0_14 = arith.constant 0 : index
    %c0_15 = arith.constant 0 : index
    %18 = vector.load %arg6[%c0_13, %c0_14, %c0_15] : memref<1x1x128xf32, #tpu.memory_space<vmem>>, vector<1x1x128xf32>
    %19 = vector.shape_cast %18 : vector<1x1x128xf32> to vector<1x128xf32>
    %20 = vector.shape_cast %17 : vector<1x128xf32> to vector<1x1x128xf32>
    tpu.vector_store %arg6[%c0_13, %c0_14, %c0_15], %20 {strides = array<i32>} : memref<1x1x128xf32, #tpu.memory_space<vmem>>, vector<1x1x128xf32>,
    return
  }
  func.func @transform_0(%arg0: i32) -> (i32, i32, i32) {
    %c0_i32 = arith.constant 0 : i32
    %c0_i32_0 = arith.constant 0 : i32
    %c0_i32_1 = arith.constant 0 : i32
    return %arg0, %c0_i32, %c0_i32_0 : i32, i32, i32
  }
  func.func @transform_1(%arg0: i32) -> (i32, i32) {
    %c0_i32 = arith.constant 0 : i32
    %c0_i32_0 = arith.constant 0 : i32
    %c0_i32_1 = arith.constant 0 : i32
    return %c0_i32, %c0_i32_0 : i32, i32
  }
  func.func @transform_2(%arg0: i32) -> (i32, i32) {
    %c0_i32 = arith.constant 0 : i32
    %c0_i32_0 = arith.constant 0 : i32
    %c0_i32_1 = arith.constant 0 : i32
    return %c0_i32, %c0_i32_0 : i32, i32
  }
  func.func @transform_3(%arg0: i32) -> (i32, i32) {
    %c0_i32 = arith.constant 0 : i32
    %c0_i32_0 = arith.constant 0 : i32
    %c0_i32_1 = arith.constant 0 : i32
    return %c0_i32, %c0_i32_0 : i32, i32
  }
  func.func @transform_4(%arg0: i32) -> (i32, i32) {
    %c0_i32 = arith.constant 0 : i32
    %c0_i32_0 = arith.constant 0 : i32
    %c0_i32_1 = arith.constant 0 : i32
    return %c0_i32, %c0_i32_0 : i32, i32
  }
  func.func @transform_5(%arg0: i32) -> (i32, i32, i32) {
    %c0_i32 = arith.constant 0 : i32
    %c0_i32_0 = arith.constant 0 : i32
    %c0_i32_1 = arith.constant 0 : i32
    return %arg0, %c0_i32, %c0_i32_0 : i32, i32, i32
  }
}

</mosaic_0001>

<bundles_post_ra>
// kernel: tpu_custom_call.1
= control target key start
LH: loop header
LB: loop body
LE: loop exit
PB: predicated region body
PF: predicated region fallthrough
CT: control target
= control target key end

     0   :  { %10 = vsyncpa [#allocation3], 0  ;;  %s820_s0 = inlined_call_operand.vmem [shape: f32[2,4,256], index: 0, kind: input, shape index: {}]   ;;  %s821_s1 = inlined_call_operand.vmem [shape: bf16[32,4], index: 1, kind: input, shape index: {}]   ;;  %s822_s2 = inlined_call_operand.vmem [shape: f32[32,1], index: 2, kind: input, shape index: {}]   ;;  %s823_s3 = inlined_call_operand.vmem [shape: bf16[32,128], index: 3, kind: input, shape index: {}]   ;;  %s824_s4 = inlined_call_operand.vmem [shape: f32[1,128], index: 4, kind: input, shape index: {}]   ;;  %s825_s5 = inlined_call_operand.hbm [shape: f32[2,1,128], index: 5, kind: output, shape index: {}]  }
   0x1   :  { %12 = vsyncpa [#allocation3 + $0x1], 0  ;;  %s693_s18 = smov 0   ;;  %s695_s19 = smov 0  }
   0x2   :  { %s697_s20 = smov 0   ;;  %s699_s21 = smov 0  }
   0x3 LB: > { %s714_s22 = sadd.s32 4294967295, %s657_s21   ;;  %s517_s23 = sadd.s32 4294967294, %s657_s21   ;;  %s657_s21 = sphi %s699_s21, %s831_s21   ;;  %s653_s20 = sphi %s697_s20, %s830_s20   ;;  %s649_s19 = sphi %s695_s19, %s829_s19   ;;  %s645_s18 = sphi %s693_s18, %s828_s18  }
   0x4   : > { %s718_s24 = sadd.s32 1, %s657_s21   ;;  %s135_s25 = sadd.s32 1, %s653_s20 }
   0x5   : > { %s132_s26 = ssub.s32 %s657_s21, %s718_s24  ;;  %p145_p0 = scmp.ne.s32.totalorder %s653_s20, %s649_s19 }
   0x6   : > { %p133_p1 = scmp.eq.s32.totalorder %s132_s26, 0  ;;  %p146_p2 = scmp.eq.s32.totalorder %s714_s22, 1 }
   0x7   : > { %p151_p3 = scmp.ne.s32.totalorder %s649_s19, %s645_s18  ;;  %p152_p4 = scmp.eq.s32.totalorder %s517_s23, 1 }
   0x8   : > { %s729_s27 = scalar_select %p133_p1, %s653_s20, %s135_s25  }
   0x9   : > { %p731_p5 = por %p146_p2, %p145_p0  ;;  %p735_p6 = por %p152_p4, %p151_p3 }
   0xa   : > { %p520_p7 = scmp.ge.s32.totalorder %s657_s21, 1  ;;  %p190_p8 = scmp.lt.s32.totalorder %s657_s21, 3 }
   0xc   : > { %p191_p9 = pnand %p520_p7, %p190_p8 }
   0xd   : > { %p217_p10 = scmp.lt.s32.totalorder (!%p191_p9), %s714_s22, 1  ;;  %v659_v0 = vmov (!%p191_p9), 0   ;;  %v233_v1 = vld [vmem:[%s822_s2] sm:$0xff] (!%p191_p9)  ;;  %v235_v2 = vld [vmem:[%s822_s2 + $0x10] sm:$0xff] (!%p191_p9)  ;;  %v234_v3 = vld [vmem:[%s822_s2 + $0x8] sm:$0xff] (!%p191_p9)  ;;  %vm274_vm0 = vcmask (!%p191_p9), 1041408  }
   0xe   : > { %194 = sbr.rel (%p191_p9) target bundleno = 754 (0x2f2), region = 40  ;;  %313 = vmatprep.mubr.bf16.mxu0 (!%p191_p9), %v659_v0  ;;  %588 = vset.pattern.permute.xlu0 (!%p191_p9), %v659_v0  ;;  %v236_v4 = vld [vmem:[%s822_s2 + $0x18] sm:$0xff] (!%p191_p9)  ;;  %v591_v10 = vld [vmem:[%s821_s1] sm:$0xff] (!%p191_p9)   ;;  %vm267_vm1 = vcmask (!%p191_p9), 31744   ;;  %v592_v11 = vld [vmem:[%s821_s1 + $0x8] sm:$0xff] (!%p191_p9)   ;;  %v660_v45 = vmov (!%p191_p9), 0.0  }
   0xf   : > { %589 = vset.pattern.permute.xlu1 (!%p191_p9), %v659_v0  ;;  %239 = vperm.xlu0 (!%p191_p9), %588, %v233_v1   ;;  %v593_v44 = vld [vmem:[%s823_s3] sm:$0xff] (!%p191_p9)   ;;  %v594_v46 = vld [vmem:[%s823_s3 + $0x8] sm:$0xff] (!%p191_p9)   ;;  %vm661_vm2 = vmmov (!%p191_p9), 0   ;;  %vm404_vm3 = vcmask (!%p191_p9), 261120   ;;  %s531_s13 = sshll.u32 (!%p191_p9), %s714_s22, 4  ;;  %s662_s26 = smov (!%p191_p9), [#allocation2]  }
  0x10   : > { %249 = vperm.xlu1 (!%p191_p9), %589, %v235_v2   ;;  %538 = vmatprep.subr.bf16.mxu1 (!%p191_p9), %v660_v45  ;;  %v391_v53 = vld [vmem:[%s824_s4] sm:$0x1] (!%p191_p9)  ;;  %s778_s23 = scalar_lea.hbm (!%p191_p9), %s825_s5, %s531_s13 }
  0x11   : > { %539 = vmatpush3.bf16.msra.mxu1 (!%p191_p9), %v593_v44  ;;  %542 = vmatprep.mubr.msk.bf16.mxu1 (!%p191_p9), %vm661_vm2, %v660_v45 }
  0x12   : > { %540 = vmatprep.subr.bf16.mxu1 (!%p191_p9), %v660_v45 }
  0x13   : > { %244 = vperm.xlu0 (!%p191_p9), %588, %v234_v3  }
  0x14   : > { %254 = vperm.xlu1 (!%p191_p9), %589, %v236_v4  }
  0x15   : > { %s218_s30 = scalar_select %p217_p10, %s714_s22, 1  ;;  %541 = vmatpush3.bf16.msra.mxu1 %v594_v46 }
  0x17   : > { %s534_s10 = sshll.u32 %s218_s30, 3  ;;  %s599_s30 = sshll.u32 %s662_s26, 4  ;;  %s600_s30 = int_to_ptr.vmem [resolvable:$false] %s599_s30 }
  0x18   : > { %s221_s15 = scalar_lea.vmem %s820_s0, %s534_s10  ;;  %s215_s10 = sand.u32 1, %s649_s19  }
  0x19   : > { %v223_v5 = vld [vmem:[%s221_s15] sm:$0xff]  ;;  %s216_s14 = scalar_lea.vmem [#allocation2], %s215_s10  ;;  %s450_s25 = scalar_lea.sflag [#allocation3], %s215_s10 }
  0x1a   : > { %v229_v6 = vcombine.high %v223_v5, %v223_v5  ;;  %v231_v7 = vpack.c.bf16 %v223_v5, %v223_v5  ;;  %s462_s15 = sshll.u32 %s216_s14, 4  ;;  %s601_s6 = scalar_lea.vmem %s600_s30, 32  ;;  %s780_s15 = int_to_ptr.vmem [resolvable:$true] %s462_s15 }
  0x1b   : > { %s595_s22 = scalar_lea.vmem %s780_s15, 16  ;;  %p602_p0 = scmp.lt.s32.totalorder %s780_s15, %s600_s30 }
  0x1c   : > { %v232_v8 = vpack.c.bf16 %v229_v6, %v229_v6  ;;  %v276_v9 = vsel %vm274_vm0, %v231_v7, 0  ;;  %p596_p11 = scmp.ne.s32.totalorder %s780_s15, %s595_s22  ;;  %p603_p1 = scmp.lt.s32.totalorder %s601_s6, %s595_s22 }
  0x1e   : > { %525 = vmatprep.subr.msk.bf16.mxu0 %vm274_vm0, %v232_v8  ;;  %p597_p12 = pnand %p596_p11, %p731_p5  ;;  %p604_p2 = por %p603_p1, %p602_p0 }
  0x1f   : > { %282 = vmatpush1.bf16.msra.mxu0 %v276_v9 }
  0x20   : > { %p598_p13 = pneg %p597_p12 }
  0x22   : > { %526 = vmatmul.mubr.msk.bf16.vlgmr.msra.gmra.mrb[0].mxu0 %vm267_vm1, %v591_v10  ;;  %p605_p3 = pnand %p604_p2, %p598_p13 }
  0x23   : > { %323 = vmatprep.mubr.bf16.mxu0 %v659_v0 }
  0x2a   : > { %527 = vmatmul.mubr.msk.bf16.gmra.mrb[4].mxu0 %vm267_vm1, %v592_v11 }
  0x8e   : > { %v240_v12 = vpop.permute.xlu0 %239 }
  0x8f   : > { %v250_v19 = vpop.permute.xlu1 %249 }
  0x92   : > { %v245_v14 = vpop.permute.xlu0 %244 }
  0x93   : > { %v255_v29 = vpop.permute.xlu1 %254 }
  0xf5   : > { %v315_v13 = vpop.f32.mrb[0].mxu0 }
  0xf6   : > { %v316_v15 = vadd.f32 %v315_v13, %v240_v12  ;;  %v317_v16 = vpop.f32.mrb[1].mxu0 }
  0xf7   : > { %v318_v17 = vadd.f32 %v317_v16, %v240_v12  ;;  %v319_v18 = vpop.f32.mrb[2].mxu0 }
  0xf8   : > { %v334_v20 = vmax.f32 %v316_v15, 0.0  ;;  %v320_v21 = vadd.f32 %v319_v18, %v245_v14  ;;  %v321_v22 = vpop.f32.mrb[3].mxu0 }
  0xf9   : > { %v335_v23 = vmax.f32 %v318_v17, 0.0  ;;  %v322_v24 = vadd.f32 %v321_v22, %v245_v14 }
  0xfa   : > { %v336_v25 = vmax.f32 %v320_v21, 0.0 }
  0xfb   : > { %v337_v26 = vmax.f32 %v322_v24, 0.0  ;;  %v342_v27 = vadd.f32 %v335_v23, %v334_v20 }
  0xfd   : > { %v325_v28 = vpop.f32.mrb[4].mxu0  ;;  %343 = vadd.xlane.f32.xlu0 %v342_v27  ;;  %v345_v30 = vadd.f32 %v337_v26, %v336_v25 }
  0xfe   : > { %v326_v31 = vadd.f32 %v325_v28, %v250_v19  ;;  %v327_v32 = vpop.f32.mrb[5].mxu0 }
  0xff   : > { %v328_v33 = vadd.f32 %v327_v32, %v250_v19  ;;  %v329_v34 = vpop.f32.mrb[6].mxu0  ;;  %346 = vadd.xlane.f32.xlu1 %v345_v30 }
 0x100   : > { %v338_v35 = vmax.f32 %v326_v31, 0.0  ;;  %v330_v36 = vadd.f32 %v329_v34, %v255_v29  ;;  %v331_v37 = vpop.f32.mrb[7].mxu0 }
 0x101   : > { %v339_v38 = vmax.f32 %v328_v33, 0.0  ;;  %v332_v39 = vadd.f32 %v331_v37, %v255_v29 }
 0x102   : > { %v340_v40 = vmax.f32 %v330_v36, 0.0 }
 0x103   : > { %v341_v41 = vmax.f32 %v332_v39, 0.0  ;;  %v348_v42 = vadd.f32 %v339_v38, %v338_v35 }
 0x105   : > { %349 = vadd.xlane.f32.xlu0 %v348_v42  ;;  %v351_v43 = vadd.f32 %v341_v41, %v340_v40 }
 0x109   : > { %352 = vadd.xlane.f32.xlu0 %v351_v43 }
 0x18a   : > { %v344_v47 = vpop.xlane.xlu0 %343 }
 0x18b   : > { %354 = vxpose.xlu1.b32.start [1/4] (short) (narrow) %v344_v47, 8 }
 0x18c   : > { %v347_v48 = vpop.xlane.xlu1 %346 }
 0x18f   : > { %355 = vxpose.xlu1.b32.cont [2/4] (short) (narrow) %v347_v48, 8 }
 0x192   : > { %v350_v49 = vpop.xlane.xlu0 %349 }
 0x193   : > { %356 = vxpose.xlu1.b32.cont [3/4] (short) (narrow) %v350_v49, 8 }
 0x196   : > { %v353_v50 = vpop.xlane.xlu0 %352 }
 0x197   : > { %357 = vxpose.xlu1.b32.end [4/4] (short) (narrow) %v353_v50, 8 }
 0x20b   : > { %v370_v51 = vpop.trf.xlu1 }
 0x20c   : > { %v386_v52 = vpack.c.bf16 %v370_v51, %v370_v51 }
 0x20e   : > { %543 = vmatmul.mubr.msk.bf16.vlgmr.msra.gmra.mrb[0].mxu1 %vm404_vm3, %v386_v52 }
 0x2e1   : > { %v442_v54 = vpop.f32.mrb[0].mxu1 }
 0x2e2   : > { %v443_v55 = vadd.f32 %v442_v54, %v391_v53  ;;  %v544_v56 = vpop.f32.mrb[1].mxu1 }
 0x2e3   : > { %v445_v57 = vpop.f32.mrb[2].mxu1 }
 0x2e4   : > { %448 = vst [vmem:[%s216_s14] sm:$0x1] %v443_v55  ;;  %v545_v58 = vpop.f32.mrb[3].mxu1 }
 0x2e5   : > { %608 = shalt.err (!%p605_p3)
}
 0x2e6   : > { %s609_s7 = scalar_lea.hbm %s778_s23, 16  ;;  %s613_s10 = scalar_lea.hbm %s825_s5, 32 }
 0x2e7   : > { %p610_p4 = scmp.ne.s32.totalorder %s778_s23, %s609_s7  ;;  %p614_p9 = scmp.lt.u32.totalorder %s778_s23, %s825_s5 }
 0x2e8   : > { %p615_p10 = scmp.lt.u32.totalorder %s613_s10, %s609_s7  ;;  %p617_p12 = scmp.lt.u32.totalorder %s609_s7, %s778_s23 }
 0x2e9   : > { %p611_p7 = pnand %p610_p4, %p731_p5 }
 0x2ea   : > { %p616_p11 = por %p615_p10, %p614_p9 }
 0x2eb   : > { %p612_p8 = pneg %p611_p7 }
 0x2ec   : > { %p618_p13 = por %p617_p12, %p616_p11 }
 0x2ee   : > { %p619_p0 = pnand %p618_p13, %p612_p8 }
 0x2f0   : > { %622 = shalt.err (!%p619_p0)
}
 0x2f1   : > { %546 = dma.vmem_to_hbm [thread:$0]  (%p731_p5), %s780_s15, 16, %s778_s23, %s450_s25  }
 0x2f2 PF: > { %p552_p1 = scmp.ge.s32.totalorder %s657_s21, 2  ;;  %s474_s13 = sand.u32 1, %s645_s18  }
 0x2f3   : > { %s475_s14 = scalar_lea.sflag [#allocation3], %s474_s13 }
 0x2f4   : > { %p549_p2 = pnand %p552_p1, %p735_p6 }
 0x2f6   : > { %640 = dma.done.wait (!%p549_p2), %s475_s14, 16  }
 0x2f7   : > { %642 = vsyncadd (!%p549_p2), %s475_s14, 4294967280  ;;  %p15_p3 = scmp.ge.s32.totalorder %s718_s24, 4   ;;  %s828_s18 = smov %s649_s19 }
 0x2f8   : > { %s829_s19 = smov %s653_s20  ;;  %s830_s20 = smov %s729_s27 }
 0x2f9   : > { %s831_s21 = smov %s718_s24  ;;  %17 = sbr.rel (!%p15_p3) target bundleno = 3 (0x3), region = 75 }
 0x300   :  { %479 = vsyncpa [#allocation3], 1 }
 0x301   :  { %481 = vsyncpa [#allocation3 + $0x1], 1 }

</bundles_post_ra>
